<compile_context>
chip_gen: v7x
topology: tpu7x:2x2x1
jax: 0.10.0
libtpu: 0.0.40
codegen_flags: <defaults>
</compile_context>

<pallas_src>
import functools
import numpy as np
import jax
import jax.numpy as jnp
from jax import lax
from jax.experimental import pallas as pl
from jax.experimental.pallas import tpu as pltpu

# ---- tiling / VMEM budgets --------------------------------------------------
TM_MM_MAX = 16384                 # max lane tile for the deform matmul (+stats)
TM_PATCH_MAX = 8192               # max lane tile for the fused patch kernel
TM_EW_MAX = 32768                 # max lane tile for the BN+LeakyReLU epilogue
MM_VMEM_PER_BUF = 12 * 1024 * 1024
PATCH_VMEM_PER_BUF = 10 * 1024 * 1024
EW_VMEM_PER_BUF = 12 * 1024 * 1024
VMEM_LIMIT = 32 * 1024 * 1024     # scoped-VMEM budget (safe on v5e/v6e/v7x)


def _round_up(x, m):
    return (x + m - 1) // m * m


def _pick_lane_tile(m, tmax, min_steps=1):
    """Largest lane tile (multiple of 128, <= tmax) covering m; optionally split
    so the (parallel) grid keeps >= min_steps steps (keeps v7x's 2 TensorCores
    busy; costs only ~0.35us extra on single-TC v5e/v6e)."""
    t_full = _round_up(max(int(m), 1), 128)
    t = min(max(int(tmax) // 128 * 128, 128), t_full)
    if min_steps > 1 and t_full > 128:
        t_split = _round_up(-(-int(m) // int(min_steps)), 128)
        t = min(t, max(t_split, 128))
    return t


def _mm_lane_tile(m, K, OC):
    per_lane = 2 * K + 4 * OC                       # bf16 P block + f32 y block
    cap = max(128, min(TM_MM_MAX, MM_VMEM_PER_BUF // per_lane) // 128 * 128)
    return _pick_lane_tile(m, cap, min_steps=2)


def _patch_lane_tile(m, C, N):
    per_lane = N * (10 * C + 12)       # 4 bf16 corners + 3 f32 rows + bf16 out
    cap = max(128, min(TM_PATCH_MAX, PATCH_VMEM_PER_BUF // per_lane) // 128 * 128)
    return _pick_lane_tile(m, cap, min_steps=2)


def _ew_hw_tile(hw, OC):
    """Largest multiple-of-128 divisor of hw within the VMEM budget (hw%128==0)."""
    per_lane = 8 * OC                               # f32 in + f32 out
    cap = max(128, min(TM_EW_MAX, EW_VMEM_PER_BUF // per_lane) // 128 * 128)
    t = min(cap, hw)
    while t > 128 and hw % t != 0:
        t -= 128
    return t


# ---------------------------------------------------------------------------
# Pallas kernel 1: lane-dense transposed matmul with fused PER-TILE per-channel
# sum / sum-of-squares (feeds training-mode BatchNorm).  Per-tile stats keep the
# lane/M grid axis fully "parallel" (v7x megacore-shardable).
# ---------------------------------------------------------------------------
def _matmul_stats_kernel(w_ref, p_ref, o_ref, psum_ref, psq_ref):
    y = jnp.dot(w_ref[...], p_ref[...], preferred_element_type=jnp.float32)
    o_ref[...] = y
    s = jnp.sum(y, axis=1, keepdims=True)            # (OC, 1)
    q = jnp.sum(y * y, axis=1, keepdims=True)        # (OC, 1)
    psum_ref[...] = jnp.broadcast_to(s, psum_ref.shape)
    psq_ref[...] = jnp.broadcast_to(q, psq_ref.shape)


def pallas_matmul_t_stats(w, p, *, tm):
    """w: (OC, K), p: (K, Mp) with Mp % tm == 0 and exactly-zero columns beyond
    the real data.  Returns (y (OC, Mp) f32, per-channel sum (OC,), per-channel
    sumsq (OC,)).  Bias-free on purpose: zero-padded columns then contribute
    exactly 0 to the fused statistics."""
    OC, K = w.shape
    K2, Mp = p.shape
    assert K == K2 and Mp % tm == 0
    nt = Mp // tm
    y, psum, psq = pl.pallas_call(
        _matmul_stats_kernel,
        out_shape=(jax.ShapeDtypeStruct((OC, Mp), jnp.float32),
                   jax.ShapeDtypeStruct((OC, nt * 128), jnp.float32),
                   jax.ShapeDtypeStruct((OC, nt * 128), jnp.float32)),
        grid_spec=pltpu.PrefetchScalarGridSpec(
            num_scalar_prefetch=0,
            grid=(nt,),
            in_specs=[pl.BlockSpec((OC, K), lambda i: (0, 0)),
                      pl.BlockSpec((K, tm), lambda i: (0, i))],
            out_specs=(pl.BlockSpec((OC, tm), lambda i: (0, i)),
                       pl.BlockSpec((OC, 128), lambda i: (0, i)),
                       pl.BlockSpec((OC, 128), lambda i: (0, i)))),
        compiler_params=pltpu.CompilerParams(
            dimension_semantics=("parallel",),
            vmem_limit_bytes=VMEM_LIMIT),
    )(w.astype(jnp.bfloat16), p.astype(jnp.bfloat16))
    csum = psum.reshape(OC, nt, 128)[:, :, 0].sum(axis=1)
    csq = psq.reshape(OC, nt, 128)[:, :, 0].sum(axis=1)
    return y, csum, csq


# ---------------------------------------------------------------------------
# Pallas kernel 2: fused bilinear weighting (coefficients computed in-kernel),
# sigmoid modulation, and zero padding -> bf16 patch matrix (C, N, Mp).
# ---------------------------------------------------------------------------
def _patch_kernel(xlt_ref, xrb_ref, xlb_ref, xrt_ref, px_ref, py_ref, ml_ref,
                  p_ref, *, hp, wp, m_valid, tm, modulation):
    i = pl.program_id(0)
    f32 = jnp.float32
    px = px_ref[...]
    py = py_ref[...]
    fx = jnp.floor(px)
    fy = jnp.floor(py)
    q_lt_x = jnp.clip(fx, 0.0, hp - 1.0)
    q_lt_y = jnp.clip(fy, 0.0, wp - 1.0)
    q_rb_x = jnp.clip(fx + 1.0, 0.0, hp - 1.0)
    q_rb_y = jnp.clip(fy + 1.0, 0.0, wp - 1.0)
    pxc = jnp.clip(px, 0.0, hp - 1.0)
    pyc = jnp.clip(py, 0.0, wp - 1.0)
    ax = 1.0 + (q_lt_x - pxc)               # x-weight of the "lt" corner
    bx = 1.0 - (q_rb_x - pxc)               # x-weight of the "rb" corner
    ay = 1.0 + (q_lt_y - pyc)
    by = 1.0 - (q_rb_y - pyc)
    x_off = ((ax * ay)[None] * xlt_ref[...].astype(f32) +
             (bx * by)[None] * xrb_ref[...].astype(f32) +
             (ax * by)[None] * xlb_ref[...].astype(f32) +
             (bx * ay)[None] * xrt_ref[...].astype(f32))
    if modulation:
        m_mod = 1.0 / (1.0 + jnp.exp(-ml_ref[...]))          # sigmoid on the EUP
        x_off = x_off * m_mod[None]
    lane = lax.broadcasted_iota(jnp.int32, x_off.shape, 2) + i * tm
    p_ref[...] = jnp.where(lane < m_valid, x_off, 0.0).astype(p_ref.dtype)


def pallas_weight_patches(x_q, px, py, m_logits, Mp, hp, wp, *, modulation=True):
    """x_q: 4 corner tensors (C, N, M) bf16; px/py/m_logits: (N, M) f32.  Returns
    the zero-padded bf16 patch matrix P (C*N, Mp), lane-dense, K ordered c*N + n
    (torch weight.reshape(OC, -1) order).  Bilinear weights + sigmoid modulation
    are computed in-kernel (no (N, M) g tensors / sigmoid pass through HBM)."""
    C, N, M = x_q[0].shape
    tm = _patch_lane_tile(Mp, C, N)
    nt = pl.cdiv(Mp, tm)
    p3 = pl.pallas_call(
        functools.partial(_patch_kernel, hp=hp, wp=wp, m_valid=M, tm=tm,
                          modulation=modulation),
        out_shape=jax.ShapeDtypeStruct((C, N, Mp), jnp.bfloat16),
        grid_spec=pltpu.PrefetchScalarGridSpec(
            num_scalar_prefetch=0,
            grid=(nt,),
            in_specs=[pl.BlockSpec((C, N, tm), lambda i: (0, 0, i))] * 4
                     + [pl.BlockSpec((N, tm), lambda i: (0, i))] * 3,
            out_specs=pl.BlockSpec((C, N, tm), lambda i: (0, 0, i))),
        compiler_params=pltpu.CompilerParams(
            dimension_semantics=("parallel",),
            vmem_limit_bytes=VMEM_LIMIT),
    )(*x_q, px, py, m_logits)
    return p3.reshape(C * N, Mp)


# ---------------------------------------------------------------------------
# Pallas kernel 3: fused BatchNorm affine (precomputed scale/shift) + LeakyReLU.
# Primary path emits the NCHW result directly (no XLA slice+transpose epilogue).
# ---------------------------------------------------------------------------
def _bn_lrelu_kernel(y_ref, scale_ref, shift_ref, o_ref, *, slope):
    z = y_ref[...] * scale_ref[...] + shift_ref[...]
    o_ref[...] = jnp.maximum(z, slope * z)          # LeakyReLU (0 < slope < 1)


def pallas_bn_lrelu_nchw(y, scale, shift, slope, *, batch, hw):
    """y: (OC, Mp) f32, columns ordered (B, h, w).  Emits (B, OC, hw) f32 NCHW
    directly.  Requires hw % 128 == 0 (lane-dense, unmasked stores)."""
    OC, Mp = y.shape
    assert hw % 128 == 0 and batch * hw <= Mp
    tile = _ew_hw_tile(hw, OC)
    n_hw = hw // tile
    return pl.pallas_call(
        functools.partial(_bn_lrelu_kernel, slope=slope),
        out_shape=jax.ShapeDtypeStruct((batch, OC, hw), jnp.float32),
        grid_spec=pltpu.PrefetchScalarGridSpec(
            num_scalar_prefetch=0,
            grid=(batch, n_hw),
            in_specs=[pl.BlockSpec((OC, tile), lambda b, j: (0, b * n_hw + j)),
                      pl.BlockSpec((OC, 1), lambda b, j: (0, 0)),
                      pl.BlockSpec((OC, 1), lambda b, j: (0, 0))],
            out_specs=pl.BlockSpec((None, OC, tile), lambda b, j: (b, 0, j))),
        compiler_params=pltpu.CompilerParams(
            dimension_semantics=("parallel", "parallel"),
            vmem_limit_bytes=VMEM_LIMIT),
    )(y, scale.reshape(OC, 1).astype(jnp.float32),
      shift.reshape(OC, 1).astype(jnp.float32))


def pallas_bn_lrelu_t(y, scale, shift, slope):
    """Fallback path (hw not a multiple of 128): (OC, Mp) -> (OC, Mp); the caller
    slices/transposes back to NCHW."""
    OC, Mp = y.shape
    cap = max(128, min(TM_EW_MAX, EW_VMEM_PER_BUF // (8 * OC)) // 128 * 128)
    tm = _pick_lane_tile(Mp, cap, min_steps=2)
    return pl.pallas_call(
        functools.partial(_bn_lrelu_kernel, slope=slope),
        out_shape=jax.ShapeDtypeStruct((OC, Mp), jnp.float32),
        grid_spec=pltpu.PrefetchScalarGridSpec(
            num_scalar_prefetch=0,
            grid=(pl.cdiv(Mp, tm),),
            in_specs=[pl.BlockSpec((OC, tm), lambda i: (0, i)),
                      pl.BlockSpec((OC, 1), lambda i: (0, 0)),
                      pl.BlockSpec((OC, 1), lambda i: (0, 0))],
            out_specs=pl.BlockSpec((OC, tm), lambda i: (0, i))),
        compiler_params=pltpu.CompilerParams(
            dimension_semantics=("parallel",),
            vmem_limit_bytes=VMEM_LIMIT),
    )(y, scale.reshape(OC, 1).astype(jnp.float32),
      shift.reshape(OC, 1).astype(jnp.float32))


# ---------------------------------------------------------------------------
# Full DeformConvBlock forward (DeformConv2d(modulation=True) + BN + LeakyReLU).
# ---------------------------------------------------------------------------
def deform_conv_block_forward(x, params, *, kernel_size=3, stride=1, padding=1,
                              relu_slop=0.2, eps=1e-5, modulation=True):
    f32 = jnp.float32
    B, C, H, W = x.shape
    ks = kernel_size
    N = ks * ks

    # ---- offset + modulation convs: one tiny fused 3x3 conv ------------------
    # TODO(synk): left to lax.conv_general_dilated (per perf review) -- a Pallas
    # version would need a halo-aware tap-accumulating matmul to avoid writing a
    # 9x-expanded im2col matrix through HBM.
    if modulation:
        w_pm = jnp.concatenate([params['p_w'], params['m_w']], axis=0)   # (3N,C,3,3)
        b_pm = jnp.concatenate([params['p_b'], params['m_b']])
    else:
        w_pm, b_pm = params['p_w'], params['p_b']
    pm = lax.conv_general_dilated(x, w_pm, (stride, stride), [(1, 1), (1, 1)],
                                  dimension_numbers=('NCHW', 'OIHW', 'NCHW'))
    pm = pm + b_pm.reshape(1, -1, 1, 1)
    h, w = pm.shape[2], pm.shape[3]
    M = B * h * w
    hw = h * w

    pm_t = jnp.transpose(pm, (1, 0, 2, 3))                               # (3N,B,h,w)
    off_x = pm_t[:N]
    off_y = pm_t[N:2 * N]
    m_logits = (pm_t[2 * N:].reshape(N, M) if modulation
                else jnp.zeros((N, M), f32))

    # ---- sampling locations p = p_0 + p_n + offset (channel-first layout) ----
    xpad = (jnp.pad(x, ((0, 0), (0, 0), (padding, padding), (padding, padding)))
            if padding else x)
    Hp, Wp = xpad.shape[2], xpad.shape[3]

    r = jnp.arange(-(ks - 1) // 2, (ks - 1) // 2 + 1, dtype=f32)
    pnx, pny = jnp.meshgrid(r, r, indexing='ij')
    pnx = pnx.reshape(N, 1, 1, 1)
    pny = pny.reshape(N, 1, 1, 1)
    p0x = jnp.arange(1, h * stride + 1, stride, dtype=f32).reshape(1, 1, h, 1)
    p0y = jnp.arange(1, w * stride + 1, stride, dtype=f32).reshape(1, 1, 1, w)

    px = p0x + pnx + off_x                                               # (N,B,h,w)
    py = p0y + pny + off_y

    fx, fy = jnp.floor(px), jnp.floor(py)
    q_lt_x = jnp.clip(fx, 0, Hp - 1)
    q_lt_y = jnp.clip(fy, 0, Wp - 1)
    q_rb_x = jnp.clip(fx + 1, 0, Hp - 1)
    q_rb_y = jnp.clip(fy + 1, 0, Wp - 1)

    # ---- bilinear corner gathers, bf16 source (halves gather + patch traffic) -
    # TODO(synk): the data-dependent gather stays in plain-JAX glue; a Pallas
    # version would need per-sample dynamic DMAs.
    x_flat = jnp.transpose(xpad, (1, 0, 2, 3)).reshape(C, B * Hp * Wp)
    x_flat = x_flat.astype(jnp.bfloat16)
    base = (jnp.arange(B, dtype=jnp.int32) * (Hp * Wp)).reshape(1, B, 1, 1)

    def gather(qx, qy):
        idx = (qx.astype(jnp.int32) * Wp + qy.astype(jnp.int32)) + base  # (N,B,h,w)
        idx = jnp.broadcast_to(idx.reshape(1, N * M), (C, N * M))
        return jnp.take_along_axis(x_flat, idx, axis=1).reshape(C, N, M)

    x_lt = gather(q_lt_x, q_lt_y)
    x_rb = gather(q_rb_x, q_rb_y)
    x_lb = gather(q_lt_x, q_rb_y)
    x_rt = gather(q_rb_x, q_lt_y)

    # ---- fused bilinear weighting + modulation -> padded bf16 patch matrix ----
    OC = params['w'].shape[0]
    K = C * N
    tm_mm = _mm_lane_tile(M, K, OC)
    Mp = _round_up(M, tm_mm)
    P = pallas_weight_patches((x_lt, x_rb, x_lb, x_rt),
                              px.reshape(N, M), py.reshape(N, M), m_logits,
                              Mp, Hp, Wp, modulation=modulation)         # (C*N, Mp)

    # ---- deformable conv == lane-dense matmul with fused per-tile BN stats ----
    y, csum, csq = pallas_matmul_t_stats(params['w'].reshape(OC, K), P, tm=tm_mm)

    # training-mode BatchNorm2d statistics over the B*h*w real columns (padded
    # columns of P are exactly 0 and the deform conv has no bias -> contribute 0).
    mean = csum / M
    var = jnp.maximum(csq / M - mean * mean, 0.0)   # guard E[y^2]-mean^2 cancellation
    scale = params['gamma'] / jnp.sqrt(var + eps)
    shift = params['beta'] - mean * scale

    # ---- fused BN affine + LeakyReLU epilogue, emitting NCHW directly --------
    if hw % 128 == 0:
        out = pallas_bn_lrelu_nchw(y, scale, shift, relu_slop, batch=B, hw=hw)
        return out.reshape(B, OC, h, w)
    out = pallas_bn_lrelu_t(y, scale, shift, relu_slop)                  # fallback
    return out[:, :M].reshape(OC, B, h, w).transpose(1, 0, 2, 3)


# ---------------------------------------------------------------------------
# Plain-JAX reference (torch layout); the deformable matmul operands are rounded
# to bf16 to mirror the Pallas kernels' MXU dtype.
# ---------------------------------------------------------------------------
def _reference_forward(x, params, *, kernel_size=3, stride=1, padding=1,
                       relu_slop=0.2, eps=1e-5):
    bf = lambda t: t.astype(jnp.bfloat16).astype(jnp.float32)
    B, C, H, W = x.shape
    ks = kernel_size
    N = ks * ks

    def conv(inp, w_, b_):
        out = lax.conv_general_dilated(inp, w_, (stride, stride), [(1, 1), (1, 1)],
                                       dimension_numbers=('NCHW', 'OIHW', 'NCHW'))
        return out + b_.reshape(1, -1, 1, 1)

    offset = conv(x, params['p_w'], params['p_b'])                    # (B, 2N, h, w)
    m = jax.nn.sigmoid(conv(x, params['m_w'], params['m_b']))         # (B, N, h, w)
    h, w = offset.shape[2], offset.shape[3]
    xpad = jnp.pad(x, ((0, 0), (0, 0), (padding, padding), (padding, padding)))
    Hp, Wp = xpad.shape[2], xpad.shape[3]

    off_t = jnp.transpose(offset, (0, 2, 3, 1))
    r = jnp.arange(-(ks - 1) // 2, (ks - 1) // 2 + 1, dtype=jnp.float32)
    pnx, pny = jnp.meshgrid(r, r, indexing='ij')
    pnx, pny = pnx.ravel(), pny.ravel()
    p0x = jnp.arange(1, h * stride + 1, stride, dtype=jnp.float32)
    p0y = jnp.arange(1, w * stride + 1, stride, dtype=jnp.float32)
    p0xg, p0yg = jnp.meshgrid(p0x, p0y, indexing='ij')
    px = p0xg[None, :, :, None] + pnx[None, None, None, :] + off_t[..., :N]
    py = p0yg[None, :, :, None] + pny[None, None, None, :] + off_t[..., N:]

    q_lt_x = jnp.clip(jnp.floor(px), 0, Hp - 1)
    q_lt_y = jnp.clip(jnp.floor(py), 0, Wp - 1)
    q_rb_x = jnp.clip(jnp.floor(px) + 1, 0, Hp - 1)
    q_rb_y = jnp.clip(jnp.floor(py) + 1, 0, Wp - 1)
    pxc = jnp.clip(px, 0, Hp - 1)
    pyc = jnp.clip(py, 0, Wp - 1)
    g_lt = (1 + (q_lt_x - pxc)) * (1 + (q_lt_y - pyc))
    g_rb = (1 - (q_rb_x - pxc)) * (1 - (q_rb_y - pyc))
    g_lb = (1 + (q_lt_x - pxc)) * (1 - (q_rb_y - pyc))
    g_rt = (1 - (q_rb_x - pxc)) * (1 + (q_lt_y - pyc))

    x_flat = xpad.reshape(B, C, Hp * Wp)

    def gather(qx, qy):
        idx = (qx * Wp + qy).astype(jnp.int32).reshape(B, 1, h * w * N)
        idx = jnp.broadcast_to(idx, (B, C, h * w * N))
        return jnp.take_along_axis(x_flat, idx, axis=2).reshape(B, C, h, w, N)

    x_off = (g_lt[:, None] * gather(q_lt_x, q_lt_y) +
             g_rb[:, None] * gather(q_rb_x, q_rb_y) +
             g_lb[:, None] * gather(q_lt_x, q_rb_y) +
             g_rt[:, None] * gather(q_rb_x, q_lt_y))
    x_off = x_off * jnp.transpose(m, (0, 2, 3, 1))[:, None]

    OC = params['w'].shape[0]
    patches = jnp.transpose(x_off, (0, 2, 3, 1, 4)).reshape(B * h * w, C * N)
    y = jnp.dot(bf(patches), bf(params['w'].reshape(OC, C * N)).T)    # (M, OC)
    mean = y.mean(axis=0)
    var = y.var(axis=0)
    z = (y - mean) / jnp.sqrt(var + eps) * params['gamma'] + params['beta']
    z = jnp.where(z >= 0, z, relu_slop * z)
    return z.reshape(B, h, w, OC).transpose(0, 3, 1, 2)


if __name__ == "__main__":
    # 1) standalone check of the matmul + fused-stats kernel (padded columns = 0)
    kc = jax.random.PRNGKey(42)
    kw_, kp_ = jax.random.split(kc, 2)
    w_t = jax.random.normal(kw_, (8, 36), jnp.float32)
    p_t = jnp.pad(jax.random.normal(kp_, (36, 500), jnp.float32), ((0, 0), (0, 12)))
    y_g, s_g, q_g = pallas_matmul_t_stats(w_t, p_t, tm=256)
    y_r = jnp.dot(w_t.astype(jnp.bfloat16).astype(jnp.float32),
                  p_t.astype(jnp.bfloat16).astype(jnp.float32))
    np.testing.assert_allclose(np.asarray(y_g), np.asarray(y_r), rtol=1e-2, atol=1e-2)
    np.testing.assert_allclose(np.asarray(s_g), np.asarray(y_r.sum(axis=1)),
                               rtol=2e-2, atol=5e-1)
    np.testing.assert_allclose(np.asarray(q_g), np.asarray((y_r * y_r).sum(axis=1)),
                               rtol=2e-2, atol=5e-1)

    # 2) full DeformConvBlock forward vs. a plain-JAX reference
    key = jax.random.PRNGKey(0)
    in_fea, out_fea, ks = 4, 8, 3
    N = ks * ks
    B, H, W = 2, 16, 16
    k1, k2, k3, k4, k5, k6, k7, k8 = jax.random.split(key, 8)
    params = dict(
        w=0.1 * jax.random.normal(k1, (out_fea, in_fea, ks, ks), jnp.float32),   # main conv (no bias)
        p_w=0.05 * jax.random.normal(k2, (2 * N, in_fea, 3, 3), jnp.float32),    # offset conv
        p_b=0.05 * jax.random.normal(k3, (2 * N,), jnp.float32),
        m_w=0.05 * jax.random.normal(k4, (N, in_fea, 3, 3), jnp.float32),        # modulation conv
        m_b=0.05 * jax.random.normal(k5, (N,), jnp.float32),
        gamma=1.0 + 0.1 * jax.random.normal(k6, (out_fea,), jnp.float32),        # BN weight
        beta=0.1 * jax.random.normal(k7, (out_fea,), jnp.float32),               # BN bias
    )
    x = jax.random.normal(k8, (B, in_fea, H, W), jnp.float32)

    out = jax.block_until_ready(jax.jit(deform_conv_block_forward)(x, params))
    assert out.shape == (B, out_fea, H, W)
    assert bool(jnp.all(jnp.isfinite(out)))

    ref_out = jax.block_until_ready(jax.jit(_reference_forward)(x, params))
    np.testing.assert_allclose(np.asarray(out), np.asarray(ref_out),
                               rtol=5e-2, atol=5e-2)
    print("KERNEL_OK")
</pallas_src>

<mosaic_0001>
module attributes {stable_mosaic.version = 11 : i64} {
  func.func @_matmul_stats_kernel(%arg0: i32, %arg1: memref<8x36xbf16, #tpu.memory_space<vmem>>, %arg2: memref<36x256xbf16, #tpu.memory_space<vmem>>, %arg3: memref<8x256xf32, #tpu.memory_space<vmem>>, %arg4: memref<8x128xf32, #tpu.memory_space<vmem>>, %arg5: memref<8x128xf32, #tpu.memory_space<vmem>>) attributes {dimension_semantics = [#tpu.dimension_semantics<parallel>], iteration_bounds = array<i64: 2>, scalar_prefetch = 0 : i64, scratch_operands = 0 : i64, tpu.core_type = #tpu.core_type<tc>, window_params = [{pipeline_mode = #tpu.pipeline_mode<synchronous>, transform_indices = @transform_0, window_bounds = array<i64: 8, 36>}, {transform_indices = @transform_1, window_bounds = array<i64: 36, 256>}, {transform_indices = @transform_2, window_bounds = array<i64: 8, 256>}, {transform_indices = @transform_3, window_bounds = array<i64: 8, 128>}, {transform_indices = @transform_4, window_bounds = array<i64: 8, 128>}]} {
    %c0 = arith.constant 0 : index
    %c0_0 = arith.constant 0 : index
    %0 = vector.load %arg1[%c0, %c0_0] : memref<8x36xbf16, #tpu.memory_space<vmem>>, vector<8x36xbf16>
    %c0_1 = arith.constant 0 : index
    %c0_2 = arith.constant 0 : index
    %1 = vector.load %arg2[%c0_1, %c0_2] : memref<36x256xbf16, #tpu.memory_space<vmem>>, vector<36x256xbf16>
    %cst = arith.constant dense<0.000000e+00> : vector<8x256xf32>
    %2 = tpu.matmul %0, %1, %cst {dimension_numbers = #tpu.dot_dimension_numbers<[1], [0], [0], [1], [0, 0, 1, 1], [], []>} : vector<8x36xbf16>, vector<36x256xbf16>, vector<8x256xf32> -> vector<8x256xf32>
    %c0_3 = arith.constant 0 : index
    %c0_4 = arith.constant 0 : index
    %3 = vector.load %arg3[%c0_3, %c0_4] : memref<8x256xf32, #tpu.memory_space<vmem>>, vector<8x256xf32>
    tpu.vector_store %arg3[%c0_3, %c0_4], %2 {strides = array<i32>} : memref<8x256xf32, #tpu.memory_space<vmem>>, vector<8x256xf32>,
    %cst_5 = arith.constant dense<0.000000e+00> : vector<8xf32>
    %4 = vector.multi_reduction <add>, %2, %cst_5 [1] : vector<8x256xf32> to vector<8xf32>
    %5 = vector.shape_cast %4 : vector<8xf32> to vector<8x1xf32>
    %6 = arith.mulf %2, %2 : vector<8x256xf32>
    %cst_6 = arith.constant dense<0.000000e+00> : vector<8xf32>
    %7 = vector.multi_reduction <add>, %6, %cst_6 [1] : vector<8x256xf32> to vector<8xf32>
    %8 = vector.shape_cast %7 : vector<8xf32> to vector<8x1xf32>
    %9 = vector.shape_cast %5 : vector<8x1xf32> to vector<8x1xf32>
    %10 = vector.broadcast %9 : vector<8x1xf32> to vector<8x128xf32>
    %c0_7 = arith.constant 0 : index
    %c0_8 = arith.constant 0 : index
    %11 = vector.load %arg4[%c0_7, %c0_8] : memref<8x128xf32, #tpu.memory_space<vmem>>, vector<8x128xf32>
    tpu.vector_store %arg4[%c0_7, %c0_8], %10 {strides = array<i32>} : memref<8x128xf32, #tpu.memory_space<vmem>>, vector<8x128xf32>,
    %12 = vector.shape_cast %8 : vector<8x1xf32> to vector<8x1xf32>
    %13 = vector.broadcast %12 : vector<8x1xf32> to vector<8x128xf32>
    %c0_9 = arith.constant 0 : index
    %c0_10 = arith.constant 0 : index
    %14 = vector.load %arg5[%c0_9, %c0_10] : memref<8x128xf32, #tpu.memory_space<vmem>>, vector<8x128xf32>
    tpu.vector_store %arg5[%c0_9, %c0_10], %13 {strides = array<i32>} : memref<8x128xf32, #tpu.memory_space<vmem>>, vector<8x128xf32>,
    return
  }
  func.func @transform_0(%arg0: i32) -> (i32, i32) {
    %c0_i32 = arith.constant 0 : i32
    %c0_i32_0 = arith.constant 0 : i32
    %c0_i32_1 = arith.constant 0 : i32
    return %c0_i32, %c0_i32_0 : i32, i32
  }
  func.func @transform_1(%arg0: i32) -> (i32, i32) {
    %c0_i32 = arith.constant 0 : i32
    %c0_i32_0 = arith.constant 0 : i32
    return %c0_i32, %arg0 : i32, i32
  }
  func.func @transform_2(%arg0: i32) -> (i32, i32) {
    %c0_i32 = arith.constant 0 : i32
    %c0_i32_0 = arith.constant 0 : i32
    return %c0_i32, %arg0 : i32, i32
  }
  func.func @transform_3(%arg0: i32) -> (i32, i32) {
    %c0_i32 = arith.constant 0 : i32
    %c0_i32_0 = arith.constant 0 : i32
    return %c0_i32, %arg0 : i32, i32
  }
  func.func @transform_4(%arg0: i32) -> (i32, i32) {
    %c0_i32 = arith.constant 0 : i32
    %c0_i32_0 = arith.constant 0 : i32
    return %c0_i32, %arg0 : i32, i32
  }
}

</mosaic_0001>

<bundles_post_ra>
// kernel: tpu_custom_call.1
= control target key start
LH: loop header
LB: loop body
LE: loop exit
PB: predicated region body
PF: predicated region fallthrough
CT: control target
= control target key end

     0   :  { %10 = vsyncpa [#allocation3], 0  ;;  %s1141_s0 = inlined_call_operand.hbm [shape: bf16[8,36], index: 0, kind: input, shape index: {}]   ;;  %s1142_s1 = inlined_call_operand.hbm [shape: bf16[36,512], index: 1, kind: input, shape index: {}]   ;;  %s1143_s2 = inlined_call_operand.hbm [shape: f32[8,512], index: 2, kind: output, shape index: {0}]   ;;  %s1144_s3 = inlined_call_operand.hbm [shape: f32[8,256], index: 3, kind: output, shape index: {1}]   ;;  %s1145_s4 = inlined_call_operand.hbm [shape: f32[8,256], index: 4, kind: output, shape index: {2}]  }
   0x1   :  { %11 = vsyncpa [#allocation6], 0 }
   0x2   :  { %13 = vsyncpa [#allocation6 + $0x1], 0 }
   0x3   :  { %14 = vsyncpa [#allocation4], 0 }
   0x4   :  { %16 = vsyncpa [#allocation4 + $0x1], 0 }
   0x5   :  { %17 = vsyncpa [#allocation9], 0 }
   0x6   :  { %19 = vsyncpa [#allocation9 + $0x1], 0  ;;  %s874_s15 = smov 0   ;;  %s876_s16 = smov 0  }
   0x7   :  { %s878_s17 = smov 0   ;;  %s880_s18 = smov 0  }
   0x8 LB: > { %s895_s19 = sadd.s32 4294967295, %s838_s18   ;;  %s539_s20 = sadd.s32 4294967294, %s838_s18   ;;  %s838_s18 = sphi %s880_s18, %s1170_s18   ;;  %s834_s17 = sphi %s878_s17, %s1169_s17   ;;  %s830_s16 = sphi %s876_s16, %s1168_s16   ;;  %s826_s15 = sphi %s874_s15, %s1167_s15  }
   0x9   : > { %s899_s21 = sadd.s32 1, %s838_s18   ;;  %s53_s22 = sadd.s32 1, %s834_s17 }
   0xa   : > { %s50_s23 = ssub.s32 %s838_s18, %s899_s21  ;;  %p60_p0 = scmp.ne.s32.totalorder %s834_s17, %s830_s16 }
   0xb   : > { %p51_p1 = scmp.eq.s32.totalorder %s50_s23, 0  ;;  %p61_p2 = scmp.eq.s32.totalorder %s838_s18, 0 }
   0xc   : > { %p66_p3 = scmp.ne.s32.totalorder %s830_s16, %s826_s15  ;;  %p1146_p4 = scmp.eq.s32.totalorder %s895_s19, 0 }
   0xd   : > { %s911_s24 = scalar_select %p51_p1, %s834_s17, %s53_s22  }
   0xe   : > { %p913_p5 = por %p61_p2, %p60_p0  ;;  %p919_p6 = por %p1146_p4, %p66_p3 }
   0xf   : > { %p90_p7 = scmp.eq.s32.totalorder %s895_s19, 1  ;;  %p96_p8 = scmp.eq.s32.totalorder %s539_s20, 1 }
  0x10   : > { %s1152_s26 = scalar_select %p919_p6, 1, 0 }
  0x11   : > { %p540_p9 = scmp.ge.s32.totalorder %s838_s18, 1  ;;  %p155_p10 = scmp.lt.s32.totalorder %s838_s18, 3 }
  0x12   : > { %p928_p11 = por %p90_p7, %p60_p0  ;;  %p932_p12 = por %p96_p8, %p66_p3 }
  0x13   : > { %p936_p13 = pnand %p540_p9, %p155_p10  ;;  %s840_s30 = smov [#allocation2]  }
  0x14   : > { %s1153_s27 = scalar_select %p928_p11, 1, 0 }
  0x15   : > { %s1154_s28 = scalar_select %p932_p12, 1, 0 }
  0x16   : > { %s1155_s29 = scalar_select %p936_p13, 1, 0 }
  0x17   : > { %p583_p2 = pneg %p936_p13  ;;  %s168_s5 = sshll.u32 %s840_s30, 4  ;;  %s169_s5 = int_to_ptr.vmem [resolvable:$true] %s168_s5 }
  0x18   : > { %p602_p4 = scmp.lt.s32.totalorder %s838_s18, 2  ;;  %p1156_p0 = scmp.eq.s32.totalorder %s895_s19, 0 }
  0x19   : > { %s179_s7 = sand.u32 1, %s834_s17   ;;  %s650_s12 = scalar_lea.hbm %s1141_s0, 64 }
  0x1a   : > { %p946_p7 = pnand %p583_p2, %p1156_p0  ;;  %p953_p3 = pnand %p602_p4, %p913_p5 }
  0x1b   : > { %s569_s9 = smul.u32 40, %s179_s7  ;;  %p651_p8 = scmp.ne.s32.totalorder %s1141_s0, %s650_s12 }
  0x1c   : > { %s1158_s8 = scalar_select %p953_p3, 1, 0 }
  0x1d   : > { %p652_p9 = pneg %p946_p7  ;;  %p657_p4 = scmp.lt.u32.totalorder %s650_s12, %s1141_s0 }
  0x1f   : > { %p653_p10 = pnand %p652_p9, %p651_p8 }
  0x21   : > { %p654_p2 = pneg %p653_p10 }
  0x23   : > { %p659_p5 = pnand %p657_p4, %p654_p2 }
  0x25   : > { %662 = shalt.err (!%p659_p5)
}
  0x26   : > { %s663_s25 = scalar_lea.vmem %s169_s5, 64  ;;  %p671_p11 = scmp.lt.s32.totalorder %s169_s5, %s169_s5 }
  0x27   : > { %p664_p0 = scmp.ne.s32.totalorder %s169_s5, %s663_s25  ;;  %p672_p6 = scmp.lt.s32.totalorder %s663_s25, %s663_s25 }
  0x29   : > { %p666_p1 = pnand %p664_p0, %p652_p9  ;;  %p673_p13 = por %p672_p6, %p671_p11 }
  0x2b   : > { %p667_p12 = pneg %p666_p1 }
  0x2d   : > { %p674_p3 = pnand %p673_p13, %p667_p12 }
  0x2f   : > { %677 = shalt.err (!%p674_p3)
}
  0x30   : > { %586 = dma.hbm_to_vmem [thread:$0]  (!%p946_p7), %s1141_s0, 64, %s169_s5, [#allocation3]  }
  0x31   : > { %s567_s11 = sshll.u32 %s838_s18, 7  ;;  %s183_s12 = scalar_lea.vmem [#allocation5], %s569_s9 }
  0x32   : > { %s190_s13 = sshll.u32 %s183_s12, 4  ;;  %s977_s23 = scalar_lea.hbm %s1142_s1, %s567_s11  ;;  %s979_s13 = int_to_ptr.vmem [resolvable:$true] %s190_s13 }
  0x33   : > { %s981_s6 = scalar_lea.sflag [#allocation6], %s179_s7  ;;  %s678_s25 = scalar_lea.hbm %s977_s23, 640 }
  0x34   : > { %p679_p6 = scmp.ne.s32.totalorder %s977_s23, %s678_s25  ;;  %p1159_p11 = scmp.ne.s32.totalorder %s1158_s8, 0 }
  0x35   : > { %s683_s30 = scalar_lea.hbm %s1142_s1, 1280  ;;  %p684_p7 = scmp.lt.u32.totalorder %s977_s23, %s1142_s1 }
  0x36   : > { %p680_p12 = pneg %p1159_p11  ;;  %p685_p3 = scmp.lt.u32.totalorder %s683_s30, %s678_s25 }
  0x37   : > { %p687_p9 = scmp.lt.u32.totalorder %s678_s25, %s977_s23 }
  0x38   : > { %p681_p13 = pnand %p680_p12, %p679_p6  ;;  %p686_p8 = por %p685_p3, %p684_p7 }
  0x3a   : > { %p682_p1 = pneg %p681_p13  ;;  %p688_p10 = por %p687_p9, %p686_p8 }
  0x3c   : > { %p689_p2 = pnand %p688_p10, %p682_p1 }
  0x3e   : > { %692 = shalt.err (!%p689_p2)
}
  0x3f   : > { %s693_s7 = scalar_lea.vmem %s979_s13, 640  ;;  %s841_s12 = smov [#allocation5]  }
  0x40   : > { %p694_p4 = scmp.ne.s32.totalorder %s979_s13, %s693_s7  ;;  %s698_s14 = sshll.u32 %s841_s12, 4  ;;  %s699_s14 = int_to_ptr.vmem [resolvable:$false] %s698_s14 }
  0x41   : > { %s700_s22 = scalar_lea.vmem %s699_s14, 1280  ;;  %p701_p6 = scmp.lt.s32.totalorder %s979_s13, %s699_s14 }
  0x42   : > { %p696_p5 = pnand %p694_p4, %p680_p12  ;;  %p702_p13 = scmp.lt.s32.totalorder %s700_s22, %s693_s7 }
  0x44   : > { %p697_p0 = pneg %p696_p5  ;;  %p703_p7 = por %p702_p13, %p701_p6 }
  0x46   : > { %p704_p3 = pnand %p703_p7, %p697_p0 }
  0x48   : > { %707 = shalt.err (!%p704_p3)
}
  0x49   : > { %s842_s25 = smov 256   ;;  %s843_s5 = smov 128  }
  0x4a   : > { %s844_s9 = smov 8   ;;  %p1160_p12 = scmp.ne.s32.totalorder %s1155_s29, 0 }
  0x4b   : > { %590 = dma.hbm_to_vmem [thread:$0]  (!%p1159_p11), %s977_s23, 640, %s979_s13, %s981_s6, %s842_s25, %s843_s5, %s844_s9  }
  0x4c   : > { %202 = sbr.rel (%p1160_p12) target bundleno = 496 (0x1f0), region = 28  ;;  %p1161_p1 = scmp.eq.s32.totalorder (!%p1160_p12), %s895_s19, 0 }
  0x53   : > { %809 = dma.done.wait (%p1161_p1), [#allocation3], 64   ;;  %p1162_p8 = pmov %p1161_p1 }
  0x54   : > { %s1016_s30 = sand.u32 1, %s830_s16   ;;  %p1163_p9 = scmp.ne.s32.totalorder %s1152_s26, 0 }
  0x55   : > { %811 = vsyncadd (%p1162_p8), [#allocation3], 4294967232  ;;  %s570_s10 = smul.u32 40, %s1016_s30  ;;  %s209_s11 = scalar_lea.sflag [#allocation6], %s1016_s30 }
  0x57   : > { %s212_s7 = scalar_lea.vmem [#allocation5], %s570_s10 }
  0x58   : > { %813 = dma.done.wait (%p1163_p9), %s209_s11, 640  }
  0x59   : > { %815 = vsyncadd (%p1163_p9), %s209_s11, 4294966656  ;;  %v845_v0 = vmov 0   ;;  %v642_v1 = vld [vmem:[%s212_s7 + $0x4] ss:$8 sps:$4 sm:$0xff]   ;;  %v644_v2 = vld [vmem:[%s212_s7] ss:$8 sps:$4 sm:$0xff]  }
  0x5a   : > { %324 = vmatprep.mubr.bf16.mxu0 %v845_v0  ;;  %292 = vmatprep.subr.bf16.mxu0 %v642_v1  ;;  %v645_v3 = vld [vmem:[%s212_s7 + $0x14] ss:$8 sps:$4 sm:$0xff]   ;;  %v255_v4 = vld [vmem:[%s212_s7 + $0x20] sm:$0x33]  ;;  %v647_v5 = vld [vmem:[%s212_s7 + $0x10] ss:$8 sps:$4 sm:$0xff]  }
  0x5b   : > { %293 = vmatpush1.bf16.msra.mxu0 %v644_v2  ;;  %v555_v6 = vcombine.high %v255_v4, %v255_v4  ;;  %v554_v7 = vcombine.low %v255_v4, %v255_v4  ;;  %vm285_vm0 = vcmask 1041408   ;;  %v250_v9 = vld [vmem:[#allocation2] sm:$0xf]  ;;  %vm281_vm1 = vcmask 293888   ;;  %s547_s26 = sshll.u32 %s1016_s30, 4  ;;  %s568_s13 = sshll.u32 %s895_s19, 8 }
  0x5c   : > { %294 = vmatprep.subr.bf16.mxu0 %v645_v3  ;;  %s232_s29 = scalar_lea.vmem [#allocation7], %s547_s26  ;;  %s368_s12 = scalar_lea.hbm %s1143_s2, %s568_s13 }
  0x5d   : > { %v287_v8 = vsel %vm285_vm0, %v554_v7, 0  ;;  %s370_s8 = sshll.u32 %s232_s29, 4  ;;  %s346_s14 = scalar_lea.sflag [#allocation4], %s1016_s30  ;;  %s1025_s8 = int_to_ptr.vmem [resolvable:$true] %s370_s8 }
  0x5e   : > { %s708_s22 = scalar_lea.vmem %s1025_s8, 256  ;;  %p1164_p10 = scmp.ne.s32.totalorder %s1153_s27, 0 }
  0x5f   : > { %295 = vmatpush1.bf16.msra.mxu0 %v647_v5  ;;  %p709_p11 = scmp.ne.s32.totalorder %s1025_s8, %s708_s22  ;;  %s846_s25 = smov [#allocation7]  }
  0x60   : > { %556 = vmatprep.subr.msk.bf16.mxu0 %vm285_vm0, %v555_v6  ;;  %s712_s5 = sshll.u32 %s846_s25, 4  ;;  %s713_s5 = int_to_ptr.vmem [resolvable:$false] %s712_s5 }
  0x61   : > { %p710_p2 = pnand %p709_p11, %p1164_p10  ;;  %s714_s9 = scalar_lea.vmem %s713_s5, 512 }
  0x62   : > { %p715_p5 = scmp.lt.s32.totalorder %s1025_s8, %s713_s5  ;;  %p716_p0 = scmp.lt.s32.totalorder %s714_s9, %s708_s22 }
  0x63   : > { %297 = vmatpush1.bf16.msra.mxu0 %v287_v8  ;;  %p711_p4 = pneg %p710_p2 }
  0x64   : > { %p717_p6 = por %p716_p0, %p715_p5 }
  0x66   : > { %557 = vmatmul.mubr.msk.bf16.vlgmr.msra.gmra.mrb[0].mxu0 %vm281_vm1, %v250_v9  ;;  %p718_p13 = pnand %p717_p6, %p711_p4 }
 0x139   : > { %v326_v10 = vpop.f32.mrb[0].mxu0 }
 0x13a   : > { %333 = vst [vmem:[%s232_s29] sm:$0xff] %v326_v10  ;;  %v328_v11 = vpop.f32.mrb[1].mxu0  ;;  %v338_v12 = vmul.f32 %v326_v10, %v326_v10 }
 0x13b   : > { %334 = vst [vmem:[%s232_s29 + $0x8] sm:$0xff] %v328_v11  ;;  %v330_v13 = vpop.f32.mrb[2].mxu0  ;;  %v335_v14 = vadd.f32 %v328_v11, %v326_v10  ;;  %v339_v15 = vmul.f32 %v328_v11, %v328_v11 }
 0x13c   : > { %v331_v16 = vpop.f32.mrb[3].mxu0 }
 0x13d   : > { %336 = vadd.xlane.f32.xlu0 %v335_v14  ;;  %v340_v17 = vadd.f32 %v339_v15, %v338_v12 }
 0x141   : > { %341 = vadd.xlane.f32.xlu0 %v340_v17 }
 0x142   : > { %721 = shalt.err (!%p718_p13)
}
 0x143   : > { %s722_s10 = scalar_lea.hbm %s368_s12, 256  ;;  %s726_s26 = scalar_lea.hbm %s1143_s2, 512 }
 0x144   : > { %p723_p7 = scmp.ne.s32.totalorder %s368_s12, %s722_s10  ;;  %p727_p1 = scmp.lt.u32.totalorder %s368_s12, %s1143_s2 }
 0x145   : > { %p728_p8 = scmp.lt.u32.totalorder %s726_s26, %s722_s10  ;;  %p730_p11 = scmp.lt.u32.totalorder %s722_s10, %s368_s12 }
 0x146   : > { %p724_p3 = pnand %p723_p7, %p1164_p10 }
 0x147   : > { %p729_p9 = por %p728_p8, %p727_p1 }
 0x148   : > { %p725_p12 = pneg %p724_p3 }
 0x149   : > { %p731_p2 = por %p730_p11, %p729_p9 }
 0x14b   : > { %p732_p4 = pnand %p731_p2, %p725_p12 }
 0x14d   : > { %735 = shalt.err (!%p732_p4)
}
 0x14e   : > { %577 = dma.vmem_to_hbm [thread:$0]  (%p1164_p10), %s1025_s8, 256, %s368_s12, %s346_s14  }
 0x14f   : > { %s548_s23 = sshll.u32 %s1016_s30, 3  ;;  %s350_s25 = sand.u32 1, %s895_s19  }
 0x150   : > { %s239_s6 = scalar_lea.vmem [#allocation8], %s548_s23  ;;  %s563_s5 = sshll.u32 %s895_s19, 7 }
 0x151   : > { %s383_s22 = sshll.u32 %s239_s6, 4  ;;  %s1058_s11 = scalar_lea.hbm %s1144_s3, %s563_s5  ;;  %s1051_s22 = int_to_ptr.vmem [resolvable:$true] %s383_s22 }
 0x152   : > { %s1060_s7 = scalar_lea.vmem [#allocation10], %s548_s23  ;;  %s1063_s8 = scalar_lea.sflag [#allocation9], %s350_s25 }
 0x153   : > { %s396_s30 = sshll.u32 %s1060_s7, 4  ;;  %s736_s12 = scalar_lea.vmem %s1051_s22, 128  ;;  %s1089_s30 = int_to_ptr.vmem [resolvable:$true] %s396_s30 }
 0x154   : > { %p737_p5 = scmp.ne.s32.totalorder %s1051_s22, %s736_s12  ;;  %s847_s14 = smov [#allocation8]  }
 0x155   : > { %s740_s26 = sshll.u32 %s847_s14, 4  ;;  %s741_s26 = int_to_ptr.vmem [resolvable:$false] %s740_s26 }
 0x156   : > { %p738_p0 = pnand %p737_p5, %p1164_p10  ;;  %s742_s29 = scalar_lea.vmem %s741_s26, 256 }
 0x157   : > { %p743_p13 = scmp.lt.s32.totalorder %s1051_s22, %s741_s26  ;;  %p744_p7 = scmp.lt.s32.totalorder %s742_s29, %s736_s12 }
 0x158   : > { %p739_p6 = pneg %p738_p0 }
 0x159   : > { %p745_p3 = por %p744_p7, %p743_p13 }
 0x15b   : > { %p746_p12 = pnand %p745_p3, %p739_p6 }
 0x1ca   : > { %v337_v18 = vpop.xlane.xlu0 %336 }
 0x1cb   : > { %343 = vst [vmem:[%s239_s6] sm:$0xff] %v337_v18 }
 0x1cc   : > { %749 = shalt.err (!%p746_p12)
}
 0x1cd   : > { %s750_s13 = scalar_lea.hbm %s1058_s11, 128  ;;  %s754_s25 = scalar_lea.hbm %s1144_s3, 256 }
 0x1ce   : > { %p751_p1 = scmp.ne.s32.totalorder %s1058_s11, %s750_s13  ;;  %p755_p11 = scmp.lt.u32.totalorder %s1058_s11, %s1144_s3 }
 0x1cf   : > { %p756_p2 = scmp.lt.u32.totalorder %s754_s25, %s750_s13  ;;  %p758_p5 = scmp.lt.u32.totalorder %s750_s13, %s1058_s11 }
 0x1d0   : > { %p752_p8 = pnand %p751_p1, %p1164_p10 }
 0x1d1   : > { %p757_p4 = por %p756_p2, %p755_p11 }
 0x1d2   : > { %p753_p9 = pneg %p752_p8 }
 0x1d3   : > { %p759_p0 = por %p758_p5, %p757_p4 }
 0x1d5   : > { %p760_p6 = pnand %p759_p0, %p753_p9 }
 0x1d7   : > { %763 = shalt.err (!%p760_p6)
}
 0x1d8   : > { %578 = dma.vmem_to_hbm [thread:$0]  (%p1164_p10), %s1051_s22, 128, %s1058_s11, %s1063_s8   ;;  %v342_v19 = vpop.xlane.xlu0 %341 }
 0x1d9   : > { %s1096_s26 = scalar_lea.hbm %s1145_s4, %s563_s5  ;;  %344 = vst [vmem:[%s1060_s7] sm:$0xff] %v342_v19  ;;  %s764_s29 = scalar_lea.vmem %s1089_s30, 128 }
 0x1da   : > { %p765_p13 = scmp.ne.s32.totalorder %s1089_s30, %s764_s29  ;;  %s848_s22 = smov [#allocation10]  }
 0x1db   : > { %s768_s11 = sshll.u32 %s848_s22, 4  ;;  %s769_s11 = int_to_ptr.vmem [resolvable:$false] %s768_s11 }
 0x1dc   : > { %p766_p7 = pnand %p765_p13, %p1164_p10  ;;  %s770_s13 = scalar_lea.vmem %s769_s11, 256 }
 0x1dd   : > { %p771_p12 = scmp.lt.s32.totalorder %s1089_s30, %s769_s11  ;;  %p772_p1 = scmp.lt.s32.totalorder %s770_s13, %s764_s29 }
 0x1de   : > { %p767_p3 = pneg %p766_p7 }
 0x1df   : > { %p773_p8 = por %p772_p1, %p771_p12 }
 0x1e1   : > { %p774_p9 = pnand %p773_p8, %p767_p3 }
 0x1e3   : > { %777 = shalt.err (!%p774_p9)
}
 0x1e4   : > { %s778_s19 = scalar_lea.hbm %s1096_s26, 128  ;;  %s782_s23 = scalar_lea.hbm %s1145_s4, 256 }
 0x1e5   : > { %p779_p11 = scmp.ne.s32.totalorder %s1096_s26, %s778_s19  ;;  %p783_p5 = scmp.lt.u32.totalorder %s1096_s26, %s1145_s4 }
 0x1e6   : > { %p784_p0 = scmp.lt.u32.totalorder %s782_s23, %s778_s19  ;;  %p786_p13 = scmp.lt.u32.totalorder %s778_s19, %s1096_s26 }
 0x1e7   : > { %p780_p2 = pnand %p779_p11, %p1164_p10 }
 0x1e8   : > { %p785_p6 = por %p784_p0, %p783_p5 }
 0x1e9   : > { %p781_p4 = pneg %p780_p2 }
 0x1ea   : > { %p787_p7 = por %p786_p13, %p785_p6 }
 0x1ec   : > { %p788_p3 = pnand %p787_p7, %p781_p4 }
 0x1ee   : > { %791 = shalt.err (!%p788_p3)
}
 0x1ef   : > { %579 = dma.vmem_to_hbm [thread:$0]  (%p1164_p10), %s1089_s30, 128, %s1096_s26, %s1063_s8  }
 0x1f0 PF: > { %s408_s9 = sand.u32 1, %s826_s15   ;;  %p1165_p12 = scmp.ne.s32.totalorder %s1154_s28, 0 }
 0x1f1   : > { %p1166_p1 = scmp.ge.s32.totalorder %s838_s18, 2  ;;  %s409_s10 = scalar_lea.sflag [#allocation4], %s408_s9 }
 0x1f3   : > { %p592_p8 = pnand %p1166_p1, %p1165_p12 }
 0x1f5   : > { %817 = dma.done.wait (!%p592_p8), %s409_s10, 256  }
 0x1f6   : > { %819 = vsyncadd (!%p592_p8), %s409_s10, 4294967040  ;;  %s417_s12 = sand.u32 1, %s539_s20  }
 0x1f7   : > { %s418_s14 = scalar_lea.sflag [#allocation9], %s417_s12 }
 0x1f8   : > { %821 = dma.done.wait (!%p592_p8), %s418_s14, 256  }
 0x1f9   : > { %823 = vsyncadd (!%p592_p8), %s418_s14, 4294967040  ;;  %p22_p10 = scmp.ge.s32.totalorder %s899_s21, 4   ;;  %s1167_s15 = smov %s830_s16 }
 0x1fa   : > { %s1168_s16 = smov %s834_s17  ;;  %s1169_s17 = smov %s911_s24 }
 0x1fb   : > { %s1170_s18 = smov %s899_s21  ;;  %24 = sbr.rel (!%p22_p10) target bundleno = 8 (0x8), region = 110 }
 0x202   :  { %432 = vsyncpa [#allocation3], 1 }
 0x203   :  { %434 = vsyncpa [#allocation3 + $0x1], 1 }
 0x204   :  { %435 = vsyncpa [#allocation6], 1 }
 0x205   :  { %437 = vsyncpa [#allocation6 + $0x1], 1 }
 0x206   :  { %438 = vsyncpa [#allocation4], 1 }
 0x207   :  { %440 = vsyncpa [#allocation4 + $0x1], 1 }
 0x208   :  { %441 = vsyncpa [#allocation9], 1 }
 0x209   :  { %443 = vsyncpa [#allocation9 + $0x1], 1 }

</bundles_post_ra>
